<compile_context>
chip_gen: v6e
topology: v6e:2x2x1
jax: 0.10.0
libtpu: 0.0.40
codegen_flags: <defaults>
</compile_context>

<pallas_src>
import math
import functools

import jax
import jax.numpy as jnp
from jax.experimental import pallas as pl
from jax.experimental.pallas import tpu as pltpu


def _scale_norm_kernel(g_ref, x_ref, o_ref, *, scale, eps):
    """One (tm, D) tile: row-wise L2 normalization with clamp + learned gain.

    g_ref : SMEM f32[1]   -- learned scalar gain
    x_ref : VMEM (tm, D)  -- input tile
    o_ref : VMEM (tm, D)  -- output tile
    """
    x = x_ref[...].astype(jnp.float32)
    ssq = jnp.sum(x * x, axis=-1, keepdims=True)   # (tm, 1) cross-lane reduce
    norm = jnp.sqrt(ssq) * scale                   # (tm, 1)
    denom = jnp.maximum(norm, eps)
    r = g_ref[0] / denom                           # one divide per row
    o_ref[...] = (x * r).astype(o_ref.dtype)       # broadcast mul per element


def _pick_tile_rows(M, D, bytes_per_elem=4):
    """Row-tile that (a) divides M, (b) is a multiple of 8 (TPU sublane rule),
    (c) stays around ~2 MiB of input per tile, and (d) leaves >= 2 grid steps
    when possible so both v7x TensorCores get work."""
    if M % 8 != 0:
        return M                                   # full-extent block is legal
    cap = max(8, (2 * 1024 * 1024) // max(D * bytes_per_elem, 1))
    cap = min(cap, max(8, M // 2))                 # prefer >= 2 tiles (megacore)
    cap = (cap // 8) * 8
    for cand in range(min(cap, M), 7, -8):
        if M % cand == 0:
            return cand
    return M


def scale_norm(x, g, *, eps=1e-5):
    """Pallas implementation of ScaleNorm.forward(x).

    x : f[..., D]
    g : f32[1]  (the learned scalar gain, nn.Parameter(torch.ones(1)))
    """
    orig_shape = x.shape
    D = int(orig_shape[-1])
    M = int(math.prod(orig_shape[:-1]))
    scale = D ** (-0.5)

    x2 = x.reshape(M, D)
    g_vec = jnp.asarray(g).reshape(1).astype(jnp.float32)

    tm = _pick_tile_rows(M, D)
    grid = (M // tm,)

    kernel = functools.partial(
        _scale_norm_kernel, scale=float(scale), eps=float(eps))

    out = pl.pallas_call(
        kernel,
        out_shape=jax.ShapeDtypeStruct((M, D), x.dtype),
        grid=grid,
        in_specs=[pl.BlockSpec(memory_space=pltpu.MemorySpace.SMEM),
                  pl.BlockSpec((tm, D), lambda i: (i, 0))],
        out_specs=pl.BlockSpec((tm, D), lambda i: (i, 0)),
        compiler_params=pltpu.CompilerParams(
            dimension_semantics=("parallel",)),
    )(g_vec, x2)

    return out.reshape(orig_shape)


def _reference(x, g, eps=1e-5):
    """Pure-JAX reference mirroring the PyTorch module."""
    D = x.shape[-1]
    scale = D ** (-0.5)
    norm = jnp.sqrt(jnp.sum(x * x, axis=-1, keepdims=True)) * scale
    return x / jnp.maximum(norm, eps) * jnp.asarray(g).reshape(())


if __name__ == "__main__":
    key = jax.random.PRNGKey(0)
    kx, kg = jax.random.split(key)

    # batch=2, channels=4, seq=16, hidden=32 -> normalize over the hidden dim.
    x = jax.random.normal(kx, (2, 4, 16, 32), dtype=jnp.float32)
    # Module default is g = ones(1); perturb it so the gain path is exercised.
    g = jnp.ones((1,), jnp.float32) + 0.1 * jax.random.normal(kg, (1,), jnp.float32)

    out = scale_norm(x, g, eps=1e-5)
    out = jax.block_until_ready(out)

    ref = _reference(x, g, eps=1e-5)
    assert out.shape == x.shape and out.dtype == x.dtype
    assert jnp.allclose(out, ref, atol=1e-5, rtol=1e-5), "mismatch vs reference"

    print("KERNEL_OK")
</pallas_src>

<mosaic_0001>
module attributes {stable_mosaic.version = 11 : i64} {
  func.func @_scale_norm_kernel(%arg0: i32, %arg1: memref<1xf32, #tpu.memory_space<smem>>, %arg2: memref<64x32xf32, #tpu.memory_space<vmem>>, %arg3: memref<64x32xf32, #tpu.memory_space<vmem>>) attributes {dimension_semantics = [#tpu.dimension_semantics<parallel>], iteration_bounds = array<i64: 2>, scalar_prefetch = 0 : i64, scratch_operands = 0 : i64, tpu.core_type = #tpu.core_type<tc>, window_params = [{transform_indices = @transform_0, window_bounds = array<i64: 1>}, {transform_indices = @transform_1, window_bounds = array<i64: 64, 32>}, {transform_indices = @transform_2, window_bounds = array<i64: 64, 32>}]} {
    %c0 = arith.constant 0 : index
    %c0_0 = arith.constant 0 : index
    %0 = vector.load %arg2[%c0, %c0_0] : memref<64x32xf32, #tpu.memory_space<vmem>>, vector<64x32xf32>
    %1 = arith.mulf %0, %0 : vector<64x32xf32>
    %cst = arith.constant dense<0.000000e+00> : vector<64xf32>
    %2 = vector.multi_reduction <add>, %1, %cst [1] : vector<64x32xf32> to vector<64xf32>
    %3 = vector.shape_cast %2 : vector<64xf32> to vector<64x1xf32>
    %4 = math.sqrt %3 : vector<64x1xf32>
    %cst_1 = arith.constant 0.176776692 : f32
    %5 = vector.broadcast %cst_1 : f32 to vector<64x1xf32>
    %6 = arith.mulf %4, %5 : vector<64x1xf32>
    %cst_2 = arith.constant 9.99999974E-6 : f32
    %7 = vector.broadcast %cst_2 : f32 to vector<64x1xf32>
    %8 = arith.maximumf %6, %7 : vector<64x1xf32>
    %c0_3 = arith.constant 0 : index
    %9 = memref.load %arg1[%c0_3] : memref<1xf32, #tpu.memory_space<smem>>
    %10 = vector.broadcast %9 : f32 to vector<64x1xf32>
    %11 = arith.divf %10, %8 : vector<64x1xf32>
    %12 = vector.broadcast %11 : vector<64x1xf32> to vector<64x32xf32>
    %13 = arith.mulf %0, %12 : vector<64x32xf32>
    %c0_4 = arith.constant 0 : index
    %c0_5 = arith.constant 0 : index
    %14 = vector.load %arg3[%c0_4, %c0_5] : memref<64x32xf32, #tpu.memory_space<vmem>>, vector<64x32xf32>
    tpu.vector_store %arg3[%c0_4, %c0_5], %13 {strides = array<i32>} : memref<64x32xf32, #tpu.memory_space<vmem>>, vector<64x32xf32>,
    return
  }
  func.func @transform_0(%arg0: i32) -> i32 {
    %c0_i32 = arith.constant 0 : i32
    %c0_i32_0 = arith.constant 0 : i32
    return %c0_i32 : i32
  }
  func.func @transform_1(%arg0: i32) -> (i32, i32) {
    %c0_i32 = arith.constant 0 : i32
    %c0_i32_0 = arith.constant 0 : i32
    return %arg0, %c0_i32 : i32, i32
  }
  func.func @transform_2(%arg0: i32) -> (i32, i32) {
    %c0_i32 = arith.constant 0 : i32
    %c0_i32_0 = arith.constant 0 : i32
    return %arg0, %c0_i32 : i32, i32
  }
}

</mosaic_0001>

<bundles_post_ra>
// kernel: tpu_custom_call.1
= control target key start
LH: loop header
LB: loop body
LE: loop exit
PB: predicated region body
PF: predicated region fallthrough
CT: control target
= control target key end

     0   :  { %s428_s11 = smov 0   ;;  %s542_s0 = inlined_call_operand.<no memory space> [shape: f32[1], index: 0, kind: input, shape index: {}]   ;;  %s543_s1 = inlined_call_operand.vmem [shape: f32[128,32], index: 1, kind: input, shape index: {}]   ;;  %s544_s2 = inlined_call_operand.vmem [shape: f32[128,32], index: 2, kind: output, shape index: {}]  }
   0x1   :  { %7 = sst [smem:[#allocation2]] %s542_s0 }
   0x2 LB: > { %s351_s12 = sadd.s32 4294967295, %s408_s11   ;;  %p355_p0 = scmp.ge.s32.totalorder %s408_s11, 1  ;;  %s408_s11 = sphi %s428_s11, %s13_s11  }
   0x3   : > { %p114_p1 = scmp.lt.s32.totalorder %s408_s11, 3 }
   0x5   : > { %p115_p2 = pnand %p355_p0, %p114_p1 }
   0x6   : > { %s356_s13 = sshll.u32 (!%p115_p2), %s351_s12, 3  ;;  %s261_s17 = sld [smem:[#allocation2]] (!%p115_p2) }
   0x7   : > { %118 = sbr.rel (%p115_p2) target bundleno = 211 (0xd3), region = 28  ;;  %p137_p3 = scmp.lt.s32.totalorder (!%p115_p2), %s356_s13, 15 }
   0xc   : > { %s546_s13 = smov (!%p137_p3, %s356_s13), 15  ;;  %vm164_vm0 = vcmask 261120  }
   0xd   : > { %s357_s0 = sshll.u32 %s546_s13, 3 }
   0xe   : > { %s140_s16 = scalar_lea.vmem %s543_s1, %s357_s0  ;;  %s146_s20 = scalar_lea.vmem %s544_s2, %s357_s0 }
   0xf   : > { %v444_v0 = vld [vmem:[%s140_s16 + $0x10] sm:$0xff]  ;;  %v446_v1 = vld [vmem:[%s140_s16] sm:$0xff]  ;;  %v448_v2 = vld [vmem:[%s140_s16 + $0x18] sm:$0xff] }
  0x10   : > { %v158_v3 = vmul.f32 %v444_v0, %v444_v0  ;;  %v156_v4 = vmul.f32 %v446_v1, %v446_v1  ;;  %v159_v5 = vmul.f32 %v448_v2, %v448_v2  ;;  %v456_v6 = vld [vmem:[%s140_s16 + $0x8] sm:$0xff]  ;;  %v462_v9 = vld [vmem:[%s140_s16 + $0x20] sm:$0xff]  ;;  %v472_v16 = vld [vmem:[%s140_s16 + $0x38] sm:$0xff] }
  0x11   : > { %v157_v7 = vmul.f32 %v456_v6, %v456_v6  ;;  %v460_v8 = vld [vmem:[%s140_s16 + $0x28] sm:$0xff]  ;;  %v160_v15 = vmul.f32 %v462_v9, %v462_v9  ;;  %v474_v17 = vld [vmem:[%s140_s16 + $0x30] sm:$0xff]  ;;  %v163_v20 = vmul.f32 %v472_v16, %v472_v16 }
  0x12   : > { %v171_v10 = vsel %vm164_vm0, %v158_v3, 0.0  ;;  %v165_v11 = vsel %vm164_vm0, %v156_v4, 0.0  ;;  %v174_v12 = vsel %vm164_vm0, %v159_v5, 0.0  ;;  %v161_v14 = vmul.f32 %v460_v8, %v460_v8 }
  0x13   : > { %172 = vadd.xlane.f32.xlu1 %v171_v10  ;;  %166 = vadd.xlane.f32.xlu0 %v165_v11  ;;  %v168_v13 = vsel %vm164_vm0, %v157_v7, 0.0  ;;  %v177_v19 = vsel %vm164_vm0, %v160_v15, 0.0  ;;  %v162_v21 = vmul.f32 %v474_v17, %v474_v17  ;;  %v186_v22 = vsel %vm164_vm0, %v163_v20, 0.0 }
  0x14   : > { %v180_v18 = vsel %vm164_vm0, %v161_v14, 0.0 }
  0x15   : > { %v183_v23 = vsel %vm164_vm0, %v162_v21, 0.0 }
  0x17   : > { %175 = vadd.xlane.f32.xlu1 %v174_v12  ;;  %169 = vadd.xlane.f32.xlu0 %v168_v13 }
  0x1b   : > { %181 = vadd.xlane.f32.xlu1 %v180_v18  ;;  %178 = vadd.xlane.f32.xlu0 %v177_v19 }
  0x1f   : > { %187 = vadd.xlane.f32.xlu1 %v186_v22  ;;  %184 = vadd.xlane.f32.xlu0 %v183_v23 }
  0x9c   : > { %v173_v24 = vpop.xlane.xlu1 %172  ;;  %v167_v25 = vpop.xlane.xlu0 %166 }
  0x9d   : > { %370 = vrsqrt.f32 %v173_v24  ;;  %vm205_vm1 = vcmp.eq.f32.partialorder %v173_v24, inf  ;;  %vm207_vm2 = vcmp.eq.f32.partialorder %v173_v24, 0.0  ;;  %v208_v35 = vand.u32 2147483648, %v173_v24 }
  0x9e   : > { %372 = vrsqrt.f32 %v167_v25  ;;  %vm191_vm3 = vcmp.eq.f32.partialorder %v167_v25, inf  ;;  %vm193_vm4 = vcmp.eq.f32.partialorder %v167_v25, 0.0  ;;  %v194_v38 = vand.u32 2147483648, %v167_v25 }
  0xa0   : > { %v176_v26 = vpop.xlane.xlu1 %175  ;;  %v170_v27 = vpop.xlane.xlu0 %169 }
  0xa1   : > { %374 = vrsqrt.f32 %v176_v26  ;;  %vm212_vm5 = vcmp.eq.f32.partialorder %v176_v26, inf  ;;  %vm214_vm6 = vcmp.eq.f32.partialorder %v176_v26, 0.0  ;;  %v215_v42 = vand.u32 2147483648, %v176_v26 }
  0xa2   : > { %376 = vrsqrt.f32 %v170_v27  ;;  %vm198_vm7 = vcmp.eq.f32.partialorder %v170_v27, inf  ;;  %vm200_vm8 = vcmp.eq.f32.partialorder %v170_v27, 0.0  ;;  %v201_v49 = vand.u32 2147483648, %v170_v27 }
  0xa4   : > { %v182_v28 = vpop.xlane.xlu1 %181  ;;  %v484_v29 = vpop.xlane.xlu0 %178 }
  0xa5   : > { %378 = vrsqrt.f32 %v182_v28  ;;  %vm226_vm9 = vcmp.eq.f32.partialorder %v182_v28, inf  ;;  %vm228_vm10 = vcmp.eq.f32.partialorder %v182_v28, 0.0  ;;  %v229_v52 = vand.u32 2147483648, %v182_v28 }
  0xa6   : > { %380 = vrsqrt.f32 %v484_v29  ;;  %vm219_vm11 = vcmp.eq.f32.partialorder %v484_v29, inf  ;;  %vm221_vm12 = vcmp.eq.f32.partialorder %v484_v29, 0.0  ;;  %v222_v4 = vand.u32 2147483648, %v484_v29 }
  0xa8   : > { %v487_v30 = vpop.xlane.xlu1 %187  ;;  %v489_v31 = vpop.xlane.xlu0 %184 }
  0xa9   : > { %382 = vrsqrt.f32 %v487_v30  ;;  %vm240_vm13 = vcmp.eq.f32.partialorder %v487_v30, inf  ;;  %vm242_vm14 = vcmp.eq.f32.partialorder %v487_v30, 0.0  ;;  %v243_v19 = vand.u32 2147483648, %v487_v30 }
  0xaa   : > { %v371_v32 = vpop.eup %370  ;;  %384 = vrsqrt.f32 %v489_v31  ;;  %vm233_vm15 = vcmp.eq.f32.partialorder %v489_v31, inf  ;;  %v236_v23 = vand.u32 2147483648, %v489_v31 }
  0xab   : > { %v373_v33 = vpop.eup %372  ;;  %v204_v34 = vmul.f32 %v371_v32, %v173_v24 }
  0xac   : > { %v190_v36 = vmul.f32 %v373_v33, %v167_v25  ;;  %v262_v33 = vstv %s261_s17 }
  0xad   : > { %v206_v37 = vsel %vm205_vm1, %v173_v24, %v204_v34  ;;  %vm235_vm1 = vcmp.eq.f32.partialorder %v489_v31, 0.0 }
  0xae   : > { %v375_v39 = vpop.eup %374  ;;  %v209_v40 = vsel %vm207_vm2, %v208_v35, %v206_v37  ;;  %v192_v41 = vsel %vm191_vm3, %v167_v25, %v190_v36 }
  0xaf   : > { %v377_v43 = vpop.eup %376  ;;  %v247_v44 = vmul.f32 0.17677669, %v209_v40  ;;  %v195_v45 = vsel %vm193_vm4, %v194_v38, %v192_v41  ;;  %v211_v46 = vmul.f32 %v375_v39, %v176_v26 }
  0xb0   : > { %v245_v47 = vmul.f32 0.17677669, %v195_v45  ;;  %v197_v48 = vmul.f32 %v377_v43, %v170_v27 }
  0xb1   : > { %v255_v50 = vmax.f32 %v247_v44, 1e-05  ;;  %v213_v51 = vsel %vm212_vm5, %v176_v26, %v211_v46 }
  0xb2   : > { %v379_v53 = vpop.eup %378  ;;  %v253_v54 = vmax.f32 %v245_v47, 1e-05  ;;  %v216_v55 = vsel %vm214_vm6, %v215_v42, %v213_v51  ;;  %v199_v56 = vsel %vm198_vm7, %v170_v27, %v197_v48 }
  0xb3   : > { %v381_v57 = vpop.eup %380  ;;  %386 = vrcp.f32 %v255_v50  ;;  %v248_v58 = vmul.f32 0.17677669, %v216_v55  ;;  %v202_v59 = vsel %vm200_vm8, %v201_v49, %v199_v56  ;;  %v225_v60 = vmul.f32 %v379_v53, %v182_v28 }
  0xb4   : > { %388 = vrcp.f32 %v253_v54  ;;  %v246_v61 = vmul.f32 0.17677669, %v202_v59  ;;  %v218_v62 = vmul.f32 %v381_v57, %v484_v29 }
  0xb5   : > { %v256_v63 = vmax.f32 %v248_v58, 1e-05  ;;  %v227_v3 = vsel %vm226_vm9, %v182_v28, %v225_v60 }
  0xb6   : > { %v383_v5 = vpop.eup %382  ;;  %v254_v7 = vmax.f32 %v246_v61, 1e-05  ;;  %v230_v10 = vsel %vm228_vm10, %v229_v52, %v227_v3  ;;  %v220_v11 = vsel %vm219_vm11, %v484_v29, %v218_v62 }
  0xb7   : > { %v385_v12 = vpop.eup %384  ;;  %390 = vrcp.f32 %v256_v63  ;;  %v250_v13 = vmul.f32 0.17677669, %v230_v10  ;;  %v223_v14 = vsel %vm221_vm12, %v222_v4, %v220_v11  ;;  %v239_v15 = vmul.f32 %v383_v5, %v487_v30 }
  0xb8   : > { %392 = vrcp.f32 %v254_v7  ;;  %v249_v18 = vmul.f32 0.17677669, %v223_v14  ;;  %v232_v20 = vmul.f32 %v385_v12, %v489_v31 }
  0xb9   : > { %v258_v21 = vmax.f32 %v250_v13, 1e-05  ;;  %v241_v22 = vsel %vm240_vm13, %v487_v30, %v239_v15 }
  0xba   : > { %v257_v24 = vmax.f32 %v249_v18, 1e-05  ;;  %v244_v25 = vsel %vm242_vm14, %v243_v19, %v241_v22  ;;  %v234_v26 = vsel %vm233_vm15, %v489_v31, %v232_v20 }
  0xbb   : > { %394 = vrcp.f32 %v258_v21  ;;  %v252_v27 = vmul.f32 0.17677669, %v244_v25  ;;  %v237_v28 = vsel %vm235_vm1, %v236_v23, %v234_v26 }
  0xbc   : > { %396 = vrcp.f32 %v257_v24  ;;  %v251_v29 = vmul.f32 0.17677669, %v237_v28 }
  0xbd   : > { %v260_v32 = vmax.f32 %v252_v27, 1e-05 }
  0xbe   : > { %v259_v34 = vmax.f32 %v251_v29, 1e-05 }
  0xbf   : > { %398 = vrcp.f32 %v260_v32 }
  0xc0   : > { %v387_v30 = vpop.eup %386  ;;  %400 = vrcp.f32 %v259_v34 }
  0xc1   : > { %v389_v35 = vpop.eup %388  ;;  %v268_v36 = vmul.f32 %v387_v30, %v262_v33 }
  0xc2   : > { %v264_v37 = vmul.f32 %v389_v35, %v262_v33 }
  0xc3   : > { %v281_v31 = vmul.f32 %v268_v36, %v444_v0 }
  0xc4   : > { %v391_v38 = vpop.eup %390  ;;  %v279_v39 = vmul.f32 %v264_v37, %v446_v1 }
  0xc5   : > { %v393_v40 = vpop.eup %392  ;;  %289 = vst.msk [vmem:[%s146_s20 + $0x10] sm:$0xff] %vm164_vm0, %v281_v31  ;;  %v270_v41 = vmul.f32 %v391_v38, %v262_v33 }
  0xc6   : > { %287 = vst.msk [vmem:[%s146_s20] sm:$0xff] %vm164_vm0, %v279_v39  ;;  %v266_v42 = vmul.f32 %v393_v40, %v262_v33 }
  0xc7   : > { %v282_v43 = vmul.f32 %v270_v41, %v448_v2 }
  0xc8   : > { %v395_v44 = vpop.eup %394  ;;  %v280_v45 = vmul.f32 %v266_v42, %v456_v6 }
  0xc9   : > { %v397_v46 = vpop.eup %396  ;;  %290 = vst.msk [vmem:[%s146_s20 + $0x18] sm:$0xff] %vm164_vm0, %v282_v43  ;;  %v274_v47 = vmul.f32 %v395_v44, %v262_v33 }
  0xca   : > { %288 = vst.msk [vmem:[%s146_s20 + $0x8] sm:$0xff] %vm164_vm0, %v280_v45  ;;  %v272_v0 = vmul.f32 %v397_v46, %v262_v33 }
  0xcb   : > { %v284_v1 = vmul.f32 %v274_v47, %v460_v8 }
  0xcc   : > { %v399_v48 = vpop.eup %398  ;;  %v283_v49 = vmul.f32 %v272_v0, %v462_v9 }
  0xcd   : > { %v401_v50 = vpop.eup %400  ;;  %292 = vst.msk [vmem:[%s146_s20 + $0x28] sm:$0xff] %vm164_vm0, %v284_v1  ;;  %v278_v51 = vmul.f32 %v399_v48, %v262_v33 }
  0xce   : > { %291 = vst.msk [vmem:[%s146_s20 + $0x20] sm:$0xff] %vm164_vm0, %v283_v49  ;;  %v276_v2 = vmul.f32 %v401_v50, %v262_v33 }
  0xcf   : > { %v286_v6 = vmul.f32 %v278_v51, %v472_v16 }
  0xd0   : > { %v285_v52 = vmul.f32 %v276_v2, %v474_v17 }
  0xd1   : > { %294 = vst.msk [vmem:[%s146_s20 + $0x38] sm:$0xff] %vm164_vm0, %v286_v6 }
  0xd2   : > { %293 = vst.msk [vmem:[%s146_s20 + $0x30] sm:$0xff] %vm164_vm0, %v285_v52 }
  0xd3 PF: > { %s13_s11 = sadd.s32 1, %s408_s11  }
  0xd4   : > { %p10_p4 = scmp.ge.s32.totalorder %s13_s11, 4  }
  0xd6   :  { %12 = sbr.rel (!%p10_p4) target bundleno = 2 (0x2), region = 58 }

</bundles_post_ra>
